<compile_context>
chip_gen: v6e
topology: v6e:2x2x1
jax: 0.10.0
libtpu: 0.0.40
codegen_flags: <defaults>
</compile_context>

<pallas_src>
from functools import partial

import numpy as np
import jax
import jax.numpy as jnp
from jax.experimental import pallas as pl
from jax.experimental.pallas import tpu as pltpu

BN_EPS = 1e-5
LANE = 128


def _actor_kernel(x_ref, wslab_ref, pack_ref, out_ref, *, s, s_pad):
    B = x_ref.shape[0]
    inv_b = jnp.float32(1.0 / B)

    # Packed per-layer row vectors: b1,g1,be1,b2,g2,be2,b3(pad),zeros.
    # Each row is used once on the (1,128) path or broadcast once at its
    # single (B,128) use site, so no repeated broadcast materialization.
    pack = pack_ref[...]                      # (8, 128) f32
    b1, g1, be1 = pack[0:1, :], pack[1:2, :], pack[2:3, :]
    b2, g2, be2 = pack[3:4, :], pack[4:5, :], pack[5:6, :]
    b3 = pack[6:7, :]

    # Static, tile-aligned views into the single bf16 weight slab.
    w1 = wslab_ref[0:s, :]                                # (S, 128)   bf16
    w2 = wslab_ref[s_pad:s_pad + LANE, :]                 # (128, 128) bf16
    w3 = wslab_ref[s_pad + LANE:s_pad + 2 * LANE, :]      # (128, 128) bf16

    x = x_ref[...].astype(jnp.bfloat16)

    # ---- fc1 + ReLU (bf16 MXU operands, f32 accumulate) -------------------
    h1 = jnp.dot(x, w1, preferred_element_type=jnp.float32) + b1
    h1 = jnp.maximum(h1, 0.0)

    # ---- BatchNorm1d #1 (train-mode batch stats), one-pass + folded affine -
    s1 = jnp.sum(h1, axis=0, keepdims=True)
    sq1 = jnp.sum(h1 * h1, axis=0, keepdims=True)
    mu = s1 * inv_b
    var = jnp.maximum(sq1 * inv_b - mu * mu, 0.0)          # biased variance
    scale = jax.lax.rsqrt(var + BN_EPS) * g1
    shift = be1 - mu * scale
    h1 = h1 * scale + shift

    # ---- fc2 + ReLU --------------------------------------------------------
    h2 = jnp.dot(h1.astype(jnp.bfloat16), w2,
                 preferred_element_type=jnp.float32) + b2
    h2 = jnp.maximum(h2, 0.0)

    # ---- BatchNorm1d #2 ----------------------------------------------------
    s2 = jnp.sum(h2, axis=0, keepdims=True)
    sq2 = jnp.sum(h2 * h2, axis=0, keepdims=True)
    mu = s2 * inv_b
    var = jnp.maximum(sq2 * inv_b - mu * mu, 0.0)
    scale = jax.lax.rsqrt(var + BN_EPS) * g2
    shift = be2 - mu * scale
    h2 = h2 * scale + shift

    # ---- fc3 (lane-padded to 128 output cols) + Tanh -----------------------
    y = jnp.dot(h2.astype(jnp.bfloat16), w3,
                preferred_element_type=jnp.float32) + b3
    out_ref[...] = jnp.tanh(y).astype(out_ref.dtype)


def actor_forward(state, params):
    """Actor forward as one Pallas kernel call.

    Returns the lane-padded (B, 128) action block; columns >= action_size are
    tanh(0)=0. The consumer slices [:, :action_size] if it needs the narrow
    view (kept out of this wrapper per perf review).
    """
    wslab, pack = params["wslab"], params["pack"]
    s_pad = params["s_pad"]
    B, S = state.shape
    NP = LANE

    args = (state, wslab, pack)

    def full_spec(a):
        return pl.BlockSpec(a.shape, lambda: (0,) * a.ndim)

    cost = pl.CostEstimate(
        flops=2 * B * (S * LANE + LANE * LANE + LANE * NP),
        transcendentals=B * NP + 2 * LANE,            # tanh + two rsqrt rows
        bytes_accessed=4 * (state.size + pack.size + B * NP) + 2 * wslab.size,
    )

    return pl.pallas_call(
        partial(_actor_kernel, s=S, s_pad=s_pad),
        out_shape=jax.ShapeDtypeStruct((B, NP), jnp.float32),
        in_specs=[full_spec(a) for a in args],
        out_specs=pl.BlockSpec((B, NP), lambda: (0, 0)),
        cost_estimate=cost,
        compiler_params=pltpu.CompilerParams(vmem_limit_bytes=16 * 1024 * 1024),
    )(*args)


def init_actor_params(key, state_size, action_size, fc1_units=128, fc2_units=128):
    """Deterministic init mirroring the PyTorch module:
       Linear weights xavier_uniform, biases 0.1; BatchNorm gamma=1, beta=0."""
    assert fc1_units == LANE and fc2_units == LANE, "pack layout assumes 128-wide hidden layers"

    def xavier(k, fan_in, fan_out):
        bound = np.sqrt(6.0 / (fan_in + fan_out))
        return jax.random.uniform(k, (fan_in, fan_out), jnp.float32, -bound, bound)

    k1, k2, k3 = jax.random.split(key, 3)
    w1 = xavier(k1, state_size, fc1_units)
    w2 = xavier(k2, fc1_units, fc2_units)
    w3 = xavier(k3, fc2_units, action_size)

    # Lane-dense padded final projection: zero columns beyond action_size.
    w3p = jnp.zeros((fc2_units, LANE), jnp.float32).at[:, :action_size].set(w3)

    # One bf16 weight slab [w1 (row-padded to a multiple of 16); w2; w3p].
    s_pad = int(-(-state_size // 16) * 16)             # bf16 sublane-pack alignment
    w1_pad = jnp.zeros((s_pad, fc1_units), jnp.float32).at[:state_size, :].set(w1)
    wslab = jnp.concatenate([w1_pad, w2, w3p], axis=0).astype(jnp.bfloat16)

    b1 = jnp.full((fc1_units,), 0.1, jnp.float32)
    b2 = jnp.full((fc2_units,), 0.1, jnp.float32)
    b3p = jnp.zeros((LANE,), jnp.float32).at[:action_size].set(0.1)
    g1 = jnp.ones((fc1_units,), jnp.float32)
    g2 = jnp.ones((fc2_units,), jnp.float32)
    be1 = jnp.zeros((fc1_units,), jnp.float32)
    be2 = jnp.zeros((fc2_units,), jnp.float32)

    # Single (8,128) f32 pack: b1,g1,be1,b2,g2,be2,b3(pad),zeros.
    pack = jnp.stack([b1, g1, be1, b2, g2, be2, b3p,
                      jnp.zeros((LANE,), jnp.float32)], axis=0)

    return {
        "wslab": wslab, "pack": pack, "s_pad": s_pad, "action_size": action_size,
        # unpacked f32 copies for the pure-JAX reference
        "w1": w1, "w2": w2, "w3": w3,
        "b1": b1, "b2": b2, "b3": b3p[:action_size],
        "g1": g1, "g2": g2, "be1": be1, "be2": be2,
    }


def actor_forward_ref(state, p):
    """Pure-JAX reference (PyTorch train-mode forward). Dots use bf16 operands
    with f32 accumulation to mirror the kernel's MXU precision; remove the
    casts if strict f32 parity is required (use precision=HIGHEST in-kernel)."""
    def bdot(a, b):
        return jnp.dot(a.astype(jnp.bfloat16), b.astype(jnp.bfloat16),
                       preferred_element_type=jnp.float32)

    h = jnp.maximum(bdot(state, p["w1"]) + p["b1"], 0.0)
    mu, var = jnp.mean(h, 0), jnp.var(h, 0)
    h = (h - mu) / jnp.sqrt(var + BN_EPS) * p["g1"] + p["be1"]
    h = jnp.maximum(bdot(h, p["w2"]) + p["b2"], 0.0)
    mu, var = jnp.mean(h, 0), jnp.var(h, 0)
    h = (h - mu) / jnp.sqrt(var + BN_EPS) * p["g2"] + p["be2"]
    return jnp.tanh(bdot(h, p["w3"]) + p["b3"])


if __name__ == "__main__":
    B, STATE_SIZE, ACTION_SIZE = 8, 32, 4        # B kept a multiple of 8 (sublane)

    key = jax.random.PRNGKey(0)
    pkey, xkey = jax.random.split(key)
    params = init_actor_params(pkey, STATE_SIZE, ACTION_SIZE)
    state = jax.random.normal(xkey, (B, STATE_SIZE), jnp.float32)

    out_padded = jax.block_until_ready(actor_forward(state, params))

    # Consumer-side slice (only needed here for the correctness check).
    out = np.asarray(out_padded)[:, :ACTION_SIZE]
    ref = np.asarray(actor_forward_ref(state, params))
    np.testing.assert_allclose(out, ref, rtol=1e-2, atol=1e-2)

    print("KERNEL_OK")
</pallas_src>

<mosaic_0001>
module attributes {stable_mosaic.version = 11 : i64} {
  func.func @_actor_kernel(%arg0: memref<8x32xf32, #tpu.memory_space<vmem>>, %arg1: memref<288x128xbf16, #tpu.memory_space<vmem>>, %arg2: memref<8x128xf32, #tpu.memory_space<vmem>>, %arg3: memref<8x128xf32, #tpu.memory_space<vmem>>) attributes {dimension_semantics = [], scalar_prefetch = 0 : i64, scratch_operands = 0 : i64, tpu.core_type = #tpu.core_type<tc>} {
    %c0 = arith.constant 0 : index
    %c0_0 = arith.constant 0 : index
    %0 = vector.load %arg2[%c0, %c0_0] : memref<8x128xf32, #tpu.memory_space<vmem>>, vector<8x128xf32>
    %1 = vector.extract_strided_slice %0 {offsets = [0, 0], sizes = [1, 128], strides = [1, 1]} : vector<8x128xf32> to vector<1x128xf32>
    %2 = vector.extract_strided_slice %0 {offsets = [1, 0], sizes = [1, 128], strides = [1, 1]} : vector<8x128xf32> to vector<1x128xf32>
    %3 = vector.extract_strided_slice %0 {offsets = [2, 0], sizes = [1, 128], strides = [1, 1]} : vector<8x128xf32> to vector<1x128xf32>
    %4 = vector.extract_strided_slice %0 {offsets = [3, 0], sizes = [1, 128], strides = [1, 1]} : vector<8x128xf32> to vector<1x128xf32>
    %5 = vector.extract_strided_slice %0 {offsets = [4, 0], sizes = [1, 128], strides = [1, 1]} : vector<8x128xf32> to vector<1x128xf32>
    %6 = vector.extract_strided_slice %0 {offsets = [5, 0], sizes = [1, 128], strides = [1, 1]} : vector<8x128xf32> to vector<1x128xf32>
    %7 = vector.extract_strided_slice %0 {offsets = [6, 0], sizes = [1, 128], strides = [1, 1]} : vector<8x128xf32> to vector<1x128xf32>
    %c0_1 = arith.constant 0 : index
    %c0_2 = arith.constant 0 : index
    %8 = vector.load %arg1[%c0_1, %c0_2] : memref<288x128xbf16, #tpu.memory_space<vmem>>, vector<32x128xbf16>
    %c32 = arith.constant 32 : index
    %c0_3 = arith.constant 0 : index
    %9 = vector.load %arg1[%c32, %c0_3] : memref<288x128xbf16, #tpu.memory_space<vmem>>, vector<128x128xbf16>
    %c160 = arith.constant 160 : index
    %c0_4 = arith.constant 0 : index
    %10 = vector.load %arg1[%c160, %c0_4] : memref<288x128xbf16, #tpu.memory_space<vmem>>, vector<128x128xbf16>
    %c0_5 = arith.constant 0 : index
    %c0_6 = arith.constant 0 : index
    %11 = vector.load %arg0[%c0_5, %c0_6] : memref<8x32xf32, #tpu.memory_space<vmem>>, vector<8x32xf32>
    %12 = arith.truncf %11 : vector<8x32xf32> to vector<8x32xbf16>
    %cst = arith.constant dense<0.000000e+00> : vector<8x128xf32>
    %13 = tpu.matmul %12, %8, %cst {dimension_numbers = #tpu.dot_dimension_numbers<[1], [0], [0], [1], [0, 0, 1, 1], [], []>} : vector<8x32xbf16>, vector<32x128xbf16>, vector<8x128xf32> -> vector<8x128xf32>
    %14 = vector.broadcast %1 : vector<1x128xf32> to vector<8x128xf32>
    %15 = arith.addf %13, %14 : vector<8x128xf32>
    %cst_7 = arith.constant 0.000000e+00 : f32
    %16 = vector.broadcast %cst_7 : f32 to vector<8x128xf32>
    %17 = arith.maximumf %15, %16 : vector<8x128xf32>
    %cst_8 = arith.constant dense<0.000000e+00> : vector<128xf32>
    %18 = vector.multi_reduction <add>, %17, %cst_8 [0] : vector<8x128xf32> to vector<128xf32>
    %19 = vector.shape_cast %18 : vector<128xf32> to vector<1x128xf32>
    %20 = arith.mulf %17, %17 : vector<8x128xf32>
    %cst_9 = arith.constant dense<0.000000e+00> : vector<128xf32>
    %21 = vector.multi_reduction <add>, %20, %cst_9 [0] : vector<8x128xf32> to vector<128xf32>
    %22 = vector.shape_cast %21 : vector<128xf32> to vector<1x128xf32>
    %cst_10 = arith.constant 1.250000e-01 : f32
    %23 = vector.broadcast %cst_10 : f32 to vector<1x128xf32>
    %24 = arith.mulf %19, %23 : vector<1x128xf32>
    %cst_11 = arith.constant 1.250000e-01 : f32
    %25 = vector.broadcast %cst_11 : f32 to vector<1x128xf32>
    %26 = arith.mulf %22, %25 : vector<1x128xf32>
    %27 = arith.mulf %24, %24 : vector<1x128xf32>
    %28 = arith.subf %26, %27 : vector<1x128xf32>
    %cst_12 = arith.constant 0.000000e+00 : f32
    %29 = vector.broadcast %cst_12 : f32 to vector<1x128xf32>
    %30 = arith.maximumf %28, %29 : vector<1x128xf32>
    %cst_13 = arith.constant 9.99999974E-6 : f32
    %31 = vector.broadcast %cst_13 : f32 to vector<1x128xf32>
    %32 = arith.addf %30, %31 : vector<1x128xf32>
    %33 = math.rsqrt %32 : vector<1x128xf32>
    %34 = arith.mulf %33, %2 : vector<1x128xf32>
    %35 = arith.mulf %24, %34 : vector<1x128xf32>
    %36 = arith.subf %3, %35 : vector<1x128xf32>
    %37 = vector.broadcast %34 : vector<1x128xf32> to vector<8x128xf32>
    %38 = arith.mulf %17, %37 : vector<8x128xf32>
    %39 = vector.broadcast %36 : vector<1x128xf32> to vector<8x128xf32>
    %40 = arith.addf %38, %39 : vector<8x128xf32>
    %41 = arith.truncf %40 : vector<8x128xf32> to vector<8x128xbf16>
    %cst_14 = arith.constant dense<0.000000e+00> : vector<8x128xf32>
    %42 = tpu.matmul %41, %9, %cst_14 {dimension_numbers = #tpu.dot_dimension_numbers<[1], [0], [0], [1], [0, 0, 1, 1], [], []>} : vector<8x128xbf16>, vector<128x128xbf16>, vector<8x128xf32> -> vector<8x128xf32>
    %43 = vector.broadcast %4 : vector<1x128xf32> to vector<8x128xf32>
    %44 = arith.addf %42, %43 : vector<8x128xf32>
    %cst_15 = arith.constant 0.000000e+00 : f32
    %45 = vector.broadcast %cst_15 : f32 to vector<8x128xf32>
    %46 = arith.maximumf %44, %45 : vector<8x128xf32>
    %cst_16 = arith.constant dense<0.000000e+00> : vector<128xf32>
    %47 = vector.multi_reduction <add>, %46, %cst_16 [0] : vector<8x128xf32> to vector<128xf32>
    %48 = vector.shape_cast %47 : vector<128xf32> to vector<1x128xf32>
    %49 = arith.mulf %46, %46 : vector<8x128xf32>
    %cst_17 = arith.constant dense<0.000000e+00> : vector<128xf32>
    %50 = vector.multi_reduction <add>, %49, %cst_17 [0] : vector<8x128xf32> to vector<128xf32>
    %51 = vector.shape_cast %50 : vector<128xf32> to vector<1x128xf32>
    %cst_18 = arith.constant 1.250000e-01 : f32
    %52 = vector.broadcast %cst_18 : f32 to vector<1x128xf32>
    %53 = arith.mulf %48, %52 : vector<1x128xf32>
    %cst_19 = arith.constant 1.250000e-01 : f32
    %54 = vector.broadcast %cst_19 : f32 to vector<1x128xf32>
    %55 = arith.mulf %51, %54 : vector<1x128xf32>
    %56 = arith.mulf %53, %53 : vector<1x128xf32>
    %57 = arith.subf %55, %56 : vector<1x128xf32>
    %cst_20 = arith.constant 0.000000e+00 : f32
    %58 = vector.broadcast %cst_20 : f32 to vector<1x128xf32>
    %59 = arith.maximumf %57, %58 : vector<1x128xf32>
    %cst_21 = arith.constant 9.99999974E-6 : f32
    %60 = vector.broadcast %cst_21 : f32 to vector<1x128xf32>
    %61 = arith.addf %59, %60 : vector<1x128xf32>
    %62 = math.rsqrt %61 : vector<1x128xf32>
    %63 = arith.mulf %62, %5 : vector<1x128xf32>
    %64 = arith.mulf %53, %63 : vector<1x128xf32>
    %65 = arith.subf %6, %64 : vector<1x128xf32>
    %66 = vector.broadcast %63 : vector<1x128xf32> to vector<8x128xf32>
    %67 = arith.mulf %46, %66 : vector<8x128xf32>
    %68 = vector.broadcast %65 : vector<1x128xf32> to vector<8x128xf32>
    %69 = arith.addf %67, %68 : vector<8x128xf32>
    %70 = arith.truncf %69 : vector<8x128xf32> to vector<8x128xbf16>
    %cst_22 = arith.constant dense<0.000000e+00> : vector<8x128xf32>
    %71 = tpu.matmul %70, %10, %cst_22 {dimension_numbers = #tpu.dot_dimension_numbers<[1], [0], [0], [1], [0, 0, 1, 1], [], []>} : vector<8x128xbf16>, vector<128x128xbf16>, vector<8x128xf32> -> vector<8x128xf32>
    %72 = vector.broadcast %7 : vector<1x128xf32> to vector<8x128xf32>
    %73 = arith.addf %71, %72 : vector<8x128xf32>
    %74 = math.tanh %73 : vector<8x128xf32>
    %c0_23 = arith.constant 0 : index
    %c0_24 = arith.constant 0 : index
    %75 = vector.load %arg3[%c0_23, %c0_24] : memref<8x128xf32, #tpu.memory_space<vmem>>, vector<8x128xf32>
    tpu.vector_store %arg3[%c0_23, %c0_24], %74 {strides = array<i32>} : memref<8x128xf32, #tpu.memory_space<vmem>>, vector<8x128xf32>,
    return
  }
}

</mosaic_0001>

<bundles_post_ra>
// kernel: tpu_custom_call.1
= control target key start
LH: loop header
LB: loop body
LE: loop exit
PB: predicated region body
PF: predicated region fallthrough
CT: control target
= control target key end

     0   :  { %8 = vsyncpa [#allocation3], 0  ;;  %s715_s0 = inlined_call_operand.hbm [shape: f32[8,32], index: 0, kind: input, shape index: {}]   ;;  %s716_s1 = inlined_call_operand.hbm [shape: bf16[288,128], index: 1, kind: input, shape index: {}]   ;;  %s717_s2 = inlined_call_operand.hbm [shape: f32[8,128], index: 2, kind: input, shape index: {}]   ;;  %s718_s3 = inlined_call_operand.hbm [shape: f32[8,128], index: 3, kind: output, shape index: {}]  }
   0x1   :  { %9 = vsyncpa [#allocation6], 0 }
   0x2   :  { %10 = vsyncpa [#allocation4], 0  ;;  %s636_s12 = smov [#allocation5]  }
   0x3   :  { %s26_s13 = sshll.u32 %s636_s12, 4  ;;  %s27_s13 = int_to_ptr.vmem [resolvable:$true] %s26_s13 }
   0x4   :  { %s558_s14 = scalar_lea.vmem %s27_s13, 2304  ;;  %p563_p1 = scmp.lt.s32.totalorder %s27_s13, %s27_s13 }
   0x5   :  { %p559_p0 = scmp.ne.s32.totalorder %s27_s13, %s558_s14  ;;  %p564_p2 = scmp.lt.s32.totalorder %s558_s14, %s558_s14 }
   0x7   :  { %p565_p3 = por %p564_p2, %p563_p1 }
   0x9   :  { %p566_p4 = pnand %p565_p3, %p559_p0 }
   0xb   :  { %569 = shalt.err (!%p566_p4)
}
   0xc   :  { %s637_s15 = smov 64   ;;  %s638_s16 = smov 4  }
   0xd   :  { %32 = dma.hbm_to_vmem [thread:$0]  %s716_s1, 2304, %s27_s13, [#allocation6], %s637_s15, %s637_s15, %s638_s16  }
   0xe   :  { %s639_s19 = smov [#allocation2]   ;;  %s640_s21 = smov [#allocation7]  }
   0xf   :  { %s17_s20 = sshll.u32 %s639_s19, 4  ;;  %s39_s22 = sshll.u32 %s640_s21, 4  ;;  %s18_s20 = int_to_ptr.vmem [resolvable:$true] %s17_s20  ;;  %s40_s22 = int_to_ptr.vmem [resolvable:$true] %s39_s22 }
  0x10   :  { %s578_s23 = scalar_lea.vmem %s18_s20, 128  ;;  %p583_p6 = scmp.lt.s32.totalorder %s18_s20, %s18_s20 }
  0x11   :  { %p579_p5 = scmp.ne.s32.totalorder %s18_s20, %s578_s23  ;;  %p584_p7 = scmp.lt.s32.totalorder %s578_s23, %s578_s23 }
  0x13   :  { %p585_p8 = por %p584_p7, %p583_p6 }
  0x15   :  { %p586_p9 = pnand %p585_p8, %p579_p5 }
  0x17   :  { %589 = shalt.err (!%p586_p9)
}
  0x18   :  { %20 = dma.hbm_to_vmem [thread:$0]  %s715_s0, 128, %s18_s20, [#allocation3]  }
  0x19   :  { %s598_s26 = scalar_lea.vmem %s40_s22, 128  ;;  %p603_p11 = scmp.lt.s32.totalorder %s40_s22, %s40_s22 }
  0x1a   :  { %p599_p10 = scmp.ne.s32.totalorder %s40_s22, %s598_s26  ;;  %p604_p12 = scmp.lt.s32.totalorder %s598_s26, %s598_s26 }
  0x1c   :  { %p605_p13 = por %p604_p12, %p603_p11 }
  0x1e   :  { %p606_p0 = pnand %p605_p13, %p599_p10 }
  0x20   :  { %609 = shalt.err (!%p606_p0)
}
  0x21   :  { %42 = dma.hbm_to_vmem [thread:$0]  %s717_s2, 128, %s40_s22, [#allocation6]  }
  0x22   :  { %630 = dma.done.wait [#allocation3], 128  }
  0x23   :  { %631 = vsyncadd [#allocation3], 4294967168 }
  0x24   :  { %632 = dma.done.wait [#allocation6], 2432  }
  0x25   :  { %633 = vsyncadd [#allocation6], 4294964864  ;;  %v641_v0 = vmov 0.0   ;;  %vm642_vm0 = vmmov 0   ;;  %v526_v1 = vld [vmem:[#allocation5 + $0x8] sm:$0xff]   ;;  %v527_v2 = vld [vmem:[#allocation5] sm:$0xff]   ;;  %v92_v13 = vlaneseq }
  0x26   :  { %470 = vmatprep.subr.bf16.mxu0 %v641_v0  ;;  %474 = vmatprep.mubr.msk.bf16.mxu0 %vm642_vm0, %v641_v0  ;;  %v90_v3 = vld [vmem:[#allocation2] sm:$0xff]  ;;  %vm108_vm1 = vcmask 261120   ;;  %v528_v5 = vld [vmem:[#allocation5 + $0x48] sm:$0xff]   ;;  %v529_v6 = vld [vmem:[#allocation5 + $0x40] sm:$0xff]   ;;  %s643_s0 = smov [#allocation8]  }
  0x27   :  { %478 = vmatprep.subr.bf16.mxu1 %v641_v0  ;;  %494 = vmatprep.mubr.msk.bf16.mxu1 %vm642_vm0, %v641_v0  ;;  %v91_v4 = vpack.c.bf16 %v90_v3, %v90_v3  ;;  %v530_v7 = vld [vmem:[#allocation5 + $0x38] sm:$0xff]   ;;  %v531_v8 = vld [vmem:[#allocation5 + $0x30] sm:$0xff]   ;;  %v532_v9 = vld [vmem:[#allocation5 + $0x28] sm:$0xff]   ;;  %v687_v14 = vshrl.u32 %v92_v13, 7  ;;  %s420_s2 = sshll.u32 %s643_s0, 4  ;;  %s421_s2 = int_to_ptr.vmem [resolvable:$true] %s420_s2 }
  0x28   :  { %471 = vmatpush3.bf16.msra.mxu0 %v526_v1  ;;  %479 = vmatpush3.bf16.msra.mxu1 %v528_v5  ;;  %v533_v10 = vld [vmem:[#allocation5 + $0x20] sm:$0xff]   ;;  %v534_v11 = vld [vmem:[#allocation5 + $0x18] sm:$0xff]   ;;  %v535_v12 = vld [vmem:[#allocation5 + $0x10] sm:$0xff]   ;;  %s610_s28 = scalar_lea.vmem %s421_s2, 128  ;;  %p615_p2 = scmp.lt.s32.totalorder %s421_s2, %s421_s2 }
  0x29   :  { %472 = vmatprep.subr.bf16.mxu0 %v641_v0  ;;  %480 = vmatprep.subr.bf16.mxu1 %v641_v0  ;;  %v94_v15 = vsub.s32 0, %v687_v14  ;;  %v690_v16 = vld [vmem:[#allocation7] sm:$0xff]  ;;  %v181_v45 = vsub.s32 1, %v687_v14  ;;  %v186_v49 = vsub.s32 2, %v687_v14  ;;  %v536_v55 = vld [vmem:[#allocation5 + $0x88] sm:$0xff]   ;;  %v537_v56 = vld [vmem:[#allocation5 + $0x80] sm:$0xff]   ;;  %p611_p1 = scmp.ne.s32.totalorder %s421_s2, %s610_s28  ;;  %p616_p3 = scmp.lt.s32.totalorder %s610_s28, %s610_s28 }
  0x2a   :  { %v538_v57 = vld [vmem:[#allocation5 + $0x78] sm:$0xff]   ;;  %v539_v58 = vld [vmem:[#allocation5 + $0x70] sm:$0xff]   ;;  %v540_v59 = vld [vmem:[#allocation5 + $0x68] sm:$0xff]   ;;  %v192_v63 = vsub.s32 3, %v687_v14 }
  0x2b   :  { %v95_v17 = vrot.slane %v690_v16, %v94_v15  ;;  %v541_v60 = vld [vmem:[#allocation5 + $0x60] sm:$0xff]   ;;  %v542_v61 = vld [vmem:[#allocation5 + $0x58] sm:$0xff]   ;;  %v543_v62 = vld [vmem:[#allocation5 + $0x50] sm:$0xff]   ;;  %p617_p4 = por %p616_p3, %p615_p2 }
  0x2c   :  { %473 = vmatpush3.bf16.msra.mxu0 %v527_v2  ;;  %481 = vmatpush3.bf16.msra.mxu1 %v529_v6  ;;  %v193_v1 = vrot.slane %v690_v16, %v192_v63 }
  0x2d   :  { %498 = vmatprep.subr.bf16.mxu0 %v641_v0  ;;  %482 = vmatprep.subr.bf16.mxu1 %v641_v0  ;;  %p618_p5 = pnand %p617_p4, %p611_p1 }
  0x2f   :  { %475 = vmatmul.mubr.msk.bf16.vlgmr.msra.gmra.mxu0 %vm108_vm1, %v91_v4 }
  0x30   :  { %514 = vmatprep.mubr.msk.bf16.mxu0 %vm642_vm0, %v641_v0  ;;  %483 = vmatpush3.bf16.msra.mxu1 %v530_v7 }
  0x31   :  { %484 = vmatprep.subr.bf16.mxu1 %v641_v0  ;;  %499 = vmatpush3.bf16.msra.mxu0 %v536_v55 }
  0x32   :  { %500 = vmatprep.subr.bf16.mxu0 %v641_v0 }
  0x34   :  { %485 = vmatpush3.bf16.msra.mxu1 %v531_v8 }
  0x35   :  { %486 = vmatprep.subr.bf16.mxu1 %v641_v0  ;;  %501 = vmatpush3.bf16.msra.mxu0 %v537_v56 }
  0x36   :  { %502 = vmatprep.subr.bf16.mxu0 %v641_v0 }
  0x38   :  { %487 = vmatpush3.bf16.msra.mxu1 %v532_v9 }
  0x39   :  { %488 = vmatprep.subr.bf16.mxu1 %v641_v0  ;;  %503 = vmatpush3.bf16.msra.mxu0 %v538_v57 }
  0x3a   :  { %504 = vmatprep.subr.bf16.mxu0 %v641_v0 }
  0x3c   :  { %489 = vmatpush3.bf16.msra.mxu1 %v533_v10 }
  0x3d   :  { %490 = vmatprep.subr.bf16.mxu1 %v641_v0  ;;  %505 = vmatpush3.bf16.msra.mxu0 %v539_v58 }
  0x3e   :  { %506 = vmatprep.subr.bf16.mxu0 %v641_v0 }
  0x40   :  { %491 = vmatpush3.bf16.msra.mxu1 %v534_v11 }
  0x41   :  { %492 = vmatprep.subr.bf16.mxu1 %v641_v0  ;;  %507 = vmatpush3.bf16.msra.mxu0 %v540_v59 }
  0x42   :  { %508 = vmatprep.subr.bf16.mxu0 %v641_v0 }
  0x44   :  { %493 = vmatpush3.bf16.msra.mxu1 %v535_v12 }
  0x45   :  { %509 = vmatpush3.bf16.msra.mxu0 %v541_v60 }
  0x46   :  { %510 = vmatprep.subr.bf16.mxu0 %v641_v0 }
  0x49   :  { %511 = vmatpush3.bf16.msra.mxu0 %v542_v61 }
  0x4a   :  { %512 = vmatprep.subr.bf16.mxu0 %v641_v0 }
  0x4d   :  { %513 = vmatpush3.bf16.msra.mxu0 %v543_v62 }
  0xef   :  { %v146_v18 = vpop.f32.mrf.mxu0 }
  0xf0   :  { %v147_v19 = vadd.f32 %v146_v18, %v95_v17 }
  0xf1   :  { %v476_v20 = vpop.f32.mrf.mxu0 }
  0xf2   :  { %v152_v21 = vmax.f32 %v147_v19, 0.0 }
  0xf3   :  { %v149_v22 = vpop.f32.mrf.mxu0 }
  0xf4   :  { %v153_v23 = vrot.slane %v152_v21, 4  ;;  %v159_v24 = vmul.f32 %v152_v21, %v152_v21 }
  0xf5   :  { %v477_v25 = vpop.f32.mrf.mxu0 }
  0xf6   :  { %v154_v26 = vadd.f32 %v153_v23, %v152_v21  ;;  %v160_v27 = vrot.slane %v159_v24, 4 }
  0xf8   :  { %v155_v28 = vrot.slane %v154_v26, 2  ;;  %v161_v29 = vadd.f32 %v160_v27, %v159_v24 }
  0xfa   :  { %v156_v30 = vadd.f32 %v155_v28, %v154_v26  ;;  %v162_v31 = vrot.slane %v161_v29, 2 }
  0xfc   :  { %v157_v32 = vrot.slane %v156_v30, 1  ;;  %v163_v33 = vadd.f32 %v162_v31, %v161_v29 }
  0xfe   :  { %v158_v34 = vadd.f32 %v157_v32, %v156_v30  ;;  %v164_v35 = vrot.slane %v163_v33, 1  ;;  %v311_v30 = vsub.s32 4, %v687_v14 }
 0x100   :  { %v165_v36 = vadd.f32 %v164_v35, %v163_v33  ;;  %v166_v37 = vmul.f32 0.125, %v158_v34  ;;  %v316_v34 = vsub.s32 5, %v687_v14 }
 0x102   :  { %v167_v38 = vmul.f32 0.125, %v165_v36  ;;  %v168_v39 = vmul.f32 %v166_v37, %v166_v37 }
 0x104   :  { %v169_v40 = vsub.f32 %v167_v38, %v168_v39 }
 0x106   :  { %v170_v41 = vmax.f32 %v169_v40, 0.0  ;;  %v322_v40 = vsub.s32 6, %v687_v14 }
 0x108   :  { %v171_v42 = vadd.f32 1e-05, %v170_v41  ;;  %v323_v41 = vrot.slane %v690_v16, %v322_v40 }
 0x10a   :  { %544 = vrsqrt.f32 %v171_v42 }
 0x117   :  { %v545_v43 = vpop.eup %544 }
 0x118   :  { %v173_v44 = vmul.f32 %v545_v43, %v690_v16 }
 0x11a   :  { %v174_v46 = vmul.f32 %v173_v44, %v166_v37  ;;  %v182_v48 = vrot.slane %v173_v44, %v181_v45 }
 0x11c   :  { %v176_v47 = vrot.slane %v174_v46, 7  ;;  %v183_v51 = vmul.f32 %v182_v48, %v152_v21 }
 0x11e   :  { %v178_v50 = vsub.f32 %v690_v16, %v176_v47 }
 0x120   :  { %v187_v52 = vrot.slane %v178_v50, %v186_v49 }
 0x122   :  { %v188_v53 = vadd.f32 %v187_v52, %v183_v51 }
 0x124   :  { %v189_v54 = vpack.c.bf16 %v188_v53, %v188_v53 }
 0x126   :  { %495 = vmatmul.mubr.bf16.vlgmr.msra.gmra.mxu1 %v189_v54 }
 0x1e6   :  { %v276_v2 = vpop.f32.mrf.mxu1 }
 0x1e7   :  { %v277_v3 = vadd.f32 %v276_v2, %v193_v1 }
 0x1e8   :  { %v496_v4 = vpop.f32.mrf.mxu1 }
 0x1e9   :  { %v282_v5 = vmax.f32 %v277_v3, 0.0 }
 0x1ea   :  { %v279_v6 = vpop.f32.mrf.mxu1 }
 0x1eb   :  { %v283_v7 = vrot.slane %v282_v5, 4  ;;  %v289_v8 = vmul.f32 %v282_v5, %v282_v5 }
 0x1ec   :  { %v497_v9 = vpop.f32.mrf.mxu1 }
 0x1ed   :  { %v284_v10 = vadd.f32 %v283_v7, %v282_v5  ;;  %v290_v11 = vrot.slane %v289_v8, 4 }
 0x1ef   :  { %v285_v12 = vrot.slane %v284_v10, 2  ;;  %v291_v13 = vadd.f32 %v290_v11, %v289_v8 }
 0x1f1   :  { %v286_v15 = vadd.f32 %v285_v12, %v284_v10  ;;  %v292_v17 = vrot.slane %v291_v13, 2 }
 0x1f3   :  { %v287_v0 = vrot.slane %v286_v15, 1  ;;  %v293_v18 = vadd.f32 %v292_v17, %v291_v13 }
 0x1f5   :  { %v288_v19 = vadd.f32 %v287_v0, %v286_v15  ;;  %v294_v20 = vrot.slane %v293_v18, 1 }
 0x1f7   :  { %v295_v21 = vadd.f32 %v294_v20, %v293_v18  ;;  %v296_v22 = vmul.f32 0.125, %v288_v19 }
 0x1f9   :  { %v297_v23 = vmul.f32 0.125, %v295_v21  ;;  %v298_v24 = vmul.f32 %v296_v22, %v296_v22 }
 0x1fb   :  { %v299_v25 = vsub.f32 %v297_v23, %v298_v24 }
 0x1fd   :  { %v300_v26 = vmax.f32 %v299_v25, 0.0 }
 0x1ff   :  { %v301_v27 = vadd.f32 1e-05, %v300_v26 }
 0x201   :  { %546 = vrsqrt.f32 %v301_v27 }
 0x20e   :  { %v547_v28 = vpop.eup %546 }
 0x20f   :  { %v303_v29 = vmul.f32 %v547_v28, %v690_v16 }
 0x211   :  { %v304_v31 = vmul.f32 %v303_v29, %v296_v22  ;;  %v312_v32 = vrot.slane %v303_v29, %v311_v30 }
 0x213   :  { %v306_v33 = vrot.slane %v304_v31, 7  ;;  %v313_v36 = vmul.f32 %v312_v32, %v282_v5 }
 0x215   :  { %v308_v35 = vsub.f32 %v690_v16, %v306_v33 }
 0x217   :  { %v317_v37 = vrot.slane %v308_v35, %v316_v34 }
 0x219   :  { %v318_v38 = vadd.f32 %v317_v37, %v313_v36 }
 0x21b   :  { %v319_v39 = vpack.c.bf16 %v318_v38, %v318_v38 }
 0x21d   :  { %515 = vmatmul.mubr.bf16.vlgmr.msra.gmra.mxu0 %v319_v39 }
 0x2dd   :  { %v406_v42 = vpop.f32.mrf.mxu0 }
 0x2de   :  { %v407_v43 = vadd.f32 %v406_v42, %v323_v41 }
 0x2df   :  { %v516_v44 = vpop.f32.mrf.mxu0 }
 0x2e0   :  { %548 = vtanh.f32 %v407_v43 }
 0x2e1   :  { %v409_v45 = vpop.f32.mrf.mxu0 }
 0x2e3   :  { %v517_v46 = vpop.f32.mrf.mxu0 }
 0x2ed   :  { %v549_v47 = vpop.eup %548 }
 0x2ee   :  { %413 = vst [vmem:[#allocation8] sm:$0xff] %v549_v47 }
 0x2ef   :  { %621 = shalt.err (!%p618_p5)
}
 0x2f0   :  { %423 = dma.vmem_to_hbm [thread:$0]  %s421_s2, 128, %s718_s3, [#allocation4]  }
 0x2f1   :  { %634 = dma.done.wait [#allocation4], 128  }
 0x2f2   :  { %635 = vsyncadd [#allocation4], 4294967168 }
 0x2f3   :  { %427 = vsyncpa [#allocation3], 1 }
 0x2f4   :  { %428 = vsyncpa [#allocation6], 1 }
 0x2f5   :  { %429 = vsyncpa [#allocation4], 1 }

</bundles_post_ra>
